<compile_context>
chip_gen: v5e
topology: v5e:2x2
jax: 0.10.0
libtpu: 0.0.40
codegen_flags: <defaults>
</compile_context>

<pallas_src>
import jax
import jax.numpy as jnp
from jax.experimental import pallas as pl
from jax.experimental.pallas import tpu as pltpu

_BN_EPS = 1e-5


def mlp_kernel(x_ref, w1_ref, gamma_ref, beta_ref, w2_ref, o_ref):
    # ---- Linear 1 on the MXU (bf16 operands, f32 accumulation). ----
    # Bias intentionally omitted: it cancels under training-mode BatchNorm.
    h = jnp.dot(x_ref[...].astype(jnp.bfloat16), w1_ref[...],
                preferred_element_type=jnp.float32)            # (B, hidden) f32

    # ---- BatchNorm1d (train mode): single-pass batch statistics, f32. ----
    inv_b = 1.0 / h.shape[0]
    mean = jnp.sum(h, axis=0, keepdims=True) * inv_b           # E[h]
    ex2 = jnp.sum(h * h, axis=0, keepdims=True) * inv_b        # E[h^2]
    var = ex2 - mean * mean                                    # biased variance

    # Fused affine: hn = h * scale + shift (the (1, hidden) math is ~free).
    scale = gamma_ref[...] * jax.lax.rsqrt(var + _BN_EPS)      # (1, hidden)
    shift = beta_ref[...] - mean * scale                       # (1, hidden)

    # ---- ReLU (f32 elementwise; keeps v5e VPU happy) ----
    r = jnp.maximum(h * scale + shift, 0.0)

    # ---- Linear 2 (no bias) on the MXU, lane-dense padded-N output. ----
    o_ref[...] = jnp.dot(r.astype(jnp.bfloat16), w2_ref[...],
                         preferred_element_type=jnp.float32).astype(o_ref.dtype)


def mlp_forward(x, w1, b1, gamma, beta, w2):
    """MLP head forward. Weights are stored pre-transposed: w1 is (dim, hidden),
    w2 is (hidden, proj). b1 is accepted for parameter parity but unused —
    it cancels exactly under training-mode BatchNorm."""
    del b1
    B, dim = x.shape
    hidden = w1.shape[1]
    proj = w2.shape[1]

    LANE = 128
    n_pad = ((proj + LANE - 1) // LANE) * LANE   # lane-dense output N
    tn = LANE                                    # N tile = parallel grid axis

    # Pad w2's N with zeros (unmasked output stores, full MXU width on matmul-2)
    # and cast MXU operands to bf16 once, outside the kernel.
    w1_bf = w1.astype(jnp.bfloat16)
    w2_bf = jnp.pad(w2, ((0, 0), (0, n_pad - proj))).astype(jnp.bfloat16)
    gamma2 = gamma.reshape(1, hidden).astype(jnp.float32)
    beta2 = beta.reshape(1, hidden).astype(jnp.float32)

    out_pad = pl.pallas_call(
        mlp_kernel,
        out_shape=jax.ShapeDtypeStruct((B, n_pad), jnp.float32),
        grid=(n_pad // tn,),
        in_specs=[
            pl.BlockSpec((B, dim), lambda j: (0, 0)),        # x (full)
            pl.BlockSpec((dim, hidden), lambda j: (0, 0)),   # W1 (full)
            pl.BlockSpec((1, hidden), lambda j: (0, 0)),     # gamma
            pl.BlockSpec((1, hidden), lambda j: (0, 0)),     # beta
            pl.BlockSpec((hidden, tn), lambda j: (0, j)),    # W2 N-tile
        ],
        out_specs=pl.BlockSpec((B, tn), lambda j: (0, j)),
        compiler_params=pltpu.CompilerParams(
            dimension_semantics=("parallel",)),  # N tiles independent -> megacore
    )(x, w1_bf, gamma2, beta2, w2_bf)

    return out_pad[:, :proj]


def reference_forward(x, w1, b1, gamma, beta, w2):
    # Exact PyTorch train-mode forward semantics in f32.
    h = x @ w1 + b1
    mean = jnp.mean(h, axis=0, keepdims=True)
    var = jnp.mean((h - mean) ** 2, axis=0, keepdims=True)
    hn = (h - mean) / jnp.sqrt(var + _BN_EPS) * gamma + beta
    r = jnp.maximum(hn, 0.0)
    return r @ w2


if __name__ == "__main__":
    # Small shapes consistent with MLP(dim, projection_size, hidden_size).
    B, dim, hidden, proj = 8, 32, 128, 16

    key = jax.random.PRNGKey(0)
    k1, k2, k3, kx = jax.random.split(key, 4)

    bound1 = 1.0 / jnp.sqrt(dim)
    w1 = jax.random.uniform(k1, (dim, hidden), jnp.float32, -bound1, bound1)
    b1 = jax.random.uniform(k2, (1, hidden), jnp.float32, -bound1, bound1)
    gamma = jnp.ones((1, hidden), jnp.float32)   # BatchNorm1d weight init
    beta = jnp.zeros((1, hidden), jnp.float32)   # BatchNorm1d bias init
    bound2 = 1.0 / jnp.sqrt(hidden)
    w2 = jax.random.uniform(k3, (hidden, proj), jnp.float32, -bound2, bound2)

    x = jax.random.normal(kx, (B, dim), jnp.float32)

    out = jax.block_until_ready(mlp_forward(x, w1, b1, gamma, beta, w2))
    ref = reference_forward(x, w1, b1, gamma, beta, w2)

    assert out.shape == (B, proj)
    # bf16 MXU operands (f32 accumulation, f32 BN math) -> loosened tolerance.
    assert jnp.allclose(out, ref, atol=5e-2, rtol=5e-2), "mismatch vs reference"

    # TODO(synk): BatchNorm1d running_mean/running_var buffer updates (a
    # train-mode side effect) are not emitted; forward output is unaffected.
    print("KERNEL_OK")
</pallas_src>

<mosaic_0001>
module attributes {stable_mosaic.version = 11 : i64} {
  func.func @mlp_kernel(%arg0: i32, %arg1: memref<8x32xf32, #tpu.memory_space<vmem>>, %arg2: memref<32x128xbf16, #tpu.memory_space<vmem>>, %arg3: memref<1x128xf32, #tpu.memory_space<vmem>>, %arg4: memref<1x128xf32, #tpu.memory_space<vmem>>, %arg5: memref<128x128xbf16, #tpu.memory_space<vmem>>, %arg6: memref<8x128xf32, #tpu.memory_space<vmem>>) attributes {dimension_semantics = [#tpu.dimension_semantics<parallel>], iteration_bounds = array<i64: 1>, scalar_prefetch = 0 : i64, scratch_operands = 0 : i64, tpu.core_type = #tpu.core_type<tc>, window_params = [{pipeline_mode = #tpu.pipeline_mode<synchronous>, transform_indices = @transform_0, window_bounds = array<i64: 8, 32>}, {pipeline_mode = #tpu.pipeline_mode<synchronous>, transform_indices = @transform_1, window_bounds = array<i64: 32, 128>}, {pipeline_mode = #tpu.pipeline_mode<synchronous>, transform_indices = @transform_2, window_bounds = array<i64: 1, 128>}, {pipeline_mode = #tpu.pipeline_mode<synchronous>, transform_indices = @transform_3, window_bounds = array<i64: 1, 128>}, {transform_indices = @transform_4, window_bounds = array<i64: 128, 128>}, {transform_indices = @transform_5, window_bounds = array<i64: 8, 128>}]} {
    %c0 = arith.constant 0 : index
    %c0_0 = arith.constant 0 : index
    %0 = vector.load %arg1[%c0, %c0_0] : memref<8x32xf32, #tpu.memory_space<vmem>>, vector<8x32xf32>
    %1 = arith.truncf %0 : vector<8x32xf32> to vector<8x32xbf16>
    %c0_1 = arith.constant 0 : index
    %c0_2 = arith.constant 0 : index
    %2 = vector.load %arg2[%c0_1, %c0_2] : memref<32x128xbf16, #tpu.memory_space<vmem>>, vector<32x128xbf16>
    %cst = arith.constant dense<0.000000e+00> : vector<8x128xf32>
    %3 = tpu.matmul %1, %2, %cst {dimension_numbers = #tpu.dot_dimension_numbers<[1], [0], [0], [1], [0, 0, 1, 1], [], []>} : vector<8x32xbf16>, vector<32x128xbf16>, vector<8x128xf32> -> vector<8x128xf32>
    %cst_3 = arith.constant dense<0.000000e+00> : vector<128xf32>
    %4 = vector.multi_reduction <add>, %3, %cst_3 [0] : vector<8x128xf32> to vector<128xf32>
    %5 = vector.shape_cast %4 : vector<128xf32> to vector<1x128xf32>
    %cst_4 = arith.constant 1.250000e-01 : f32
    %6 = vector.broadcast %cst_4 : f32 to vector<1x128xf32>
    %7 = arith.mulf %5, %6 : vector<1x128xf32>
    %8 = arith.mulf %3, %3 : vector<8x128xf32>
    %cst_5 = arith.constant dense<0.000000e+00> : vector<128xf32>
    %9 = vector.multi_reduction <add>, %8, %cst_5 [0] : vector<8x128xf32> to vector<128xf32>
    %10 = vector.shape_cast %9 : vector<128xf32> to vector<1x128xf32>
    %cst_6 = arith.constant 1.250000e-01 : f32
    %11 = vector.broadcast %cst_6 : f32 to vector<1x128xf32>
    %12 = arith.mulf %10, %11 : vector<1x128xf32>
    %13 = arith.mulf %7, %7 : vector<1x128xf32>
    %14 = arith.subf %12, %13 : vector<1x128xf32>
    %c0_7 = arith.constant 0 : index
    %c0_8 = arith.constant 0 : index
    %15 = vector.load %arg3[%c0_7, %c0_8] : memref<1x128xf32, #tpu.memory_space<vmem>>, vector<1x128xf32>
    %cst_9 = arith.constant 9.99999974E-6 : f32
    %16 = vector.broadcast %cst_9 : f32 to vector<1x128xf32>
    %17 = arith.addf %14, %16 : vector<1x128xf32>
    %18 = math.rsqrt %17 : vector<1x128xf32>
    %19 = arith.mulf %15, %18 : vector<1x128xf32>
    %c0_10 = arith.constant 0 : index
    %c0_11 = arith.constant 0 : index
    %20 = vector.load %arg4[%c0_10, %c0_11] : memref<1x128xf32, #tpu.memory_space<vmem>>, vector<1x128xf32>
    %21 = arith.mulf %7, %19 : vector<1x128xf32>
    %22 = arith.subf %20, %21 : vector<1x128xf32>
    %23 = vector.broadcast %19 : vector<1x128xf32> to vector<8x128xf32>
    %24 = arith.mulf %3, %23 : vector<8x128xf32>
    %25 = vector.broadcast %22 : vector<1x128xf32> to vector<8x128xf32>
    %26 = arith.addf %24, %25 : vector<8x128xf32>
    %cst_12 = arith.constant 0.000000e+00 : f32
    %27 = vector.broadcast %cst_12 : f32 to vector<8x128xf32>
    %28 = arith.maximumf %26, %27 : vector<8x128xf32>
    %29 = arith.truncf %28 : vector<8x128xf32> to vector<8x128xbf16>
    %c0_13 = arith.constant 0 : index
    %c0_14 = arith.constant 0 : index
    %30 = vector.load %arg5[%c0_13, %c0_14] : memref<128x128xbf16, #tpu.memory_space<vmem>>, vector<128x128xbf16>
    %cst_15 = arith.constant dense<0.000000e+00> : vector<8x128xf32>
    %31 = tpu.matmul %29, %30, %cst_15 {dimension_numbers = #tpu.dot_dimension_numbers<[1], [0], [0], [1], [0, 0, 1, 1], [], []>} : vector<8x128xbf16>, vector<128x128xbf16>, vector<8x128xf32> -> vector<8x128xf32>
    %c0_16 = arith.constant 0 : index
    %c0_17 = arith.constant 0 : index
    %32 = vector.load %arg6[%c0_16, %c0_17] : memref<8x128xf32, #tpu.memory_space<vmem>>, vector<8x128xf32>
    tpu.vector_store %arg6[%c0_16, %c0_17], %31 {strides = array<i32>} : memref<8x128xf32, #tpu.memory_space<vmem>>, vector<8x128xf32>,
    return
  }
  func.func @transform_0(%arg0: i32) -> (i32, i32) {
    %c0_i32 = arith.constant 0 : i32
    %c0_i32_0 = arith.constant 0 : i32
    %c0_i32_1 = arith.constant 0 : i32
    return %c0_i32, %c0_i32_0 : i32, i32
  }
  func.func @transform_1(%arg0: i32) -> (i32, i32) {
    %c0_i32 = arith.constant 0 : i32
    %c0_i32_0 = arith.constant 0 : i32
    %c0_i32_1 = arith.constant 0 : i32
    return %c0_i32, %c0_i32_0 : i32, i32
  }
  func.func @transform_2(%arg0: i32) -> (i32, i32) {
    %c0_i32 = arith.constant 0 : i32
    %c0_i32_0 = arith.constant 0 : i32
    %c0_i32_1 = arith.constant 0 : i32
    return %c0_i32, %c0_i32_0 : i32, i32
  }
  func.func @transform_3(%arg0: i32) -> (i32, i32) {
    %c0_i32 = arith.constant 0 : i32
    %c0_i32_0 = arith.constant 0 : i32
    %c0_i32_1 = arith.constant 0 : i32
    return %c0_i32, %c0_i32_0 : i32, i32
  }
  func.func @transform_4(%arg0: i32) -> (i32, i32) {
    %c0_i32 = arith.constant 0 : i32
    %c0_i32_0 = arith.constant 0 : i32
    return %c0_i32, %arg0 : i32, i32
  }
  func.func @transform_5(%arg0: i32) -> (i32, i32) {
    %c0_i32 = arith.constant 0 : i32
    %c0_i32_0 = arith.constant 0 : i32
    return %c0_i32, %arg0 : i32, i32
  }
}

</mosaic_0001>

<bundles_post_ra>
// kernel: tpu_custom_call.1
= control target key start
LH: loop header
LB: loop body
LE: loop exit
PB: predicated region body
PF: predicated region fallthrough
CT: control target
= control target key end

     0   :  { %10 = vsyncpa [#allocation3], 0  ;;  %s456_s0 = inlined_call_operand.hbm [shape: f32[8,32], index: 0, kind: input, shape index: {}]   ;;  %s457_s1 = inlined_call_operand.hbm [shape: bf16[32,128], index: 1, kind: input, shape index: {}]   ;;  %s458_s2 = inlined_call_operand.vmem [shape: f32[1,128], index: 2, kind: input, shape index: {}]   ;;  %s459_s3 = inlined_call_operand.vmem [shape: f32[1,128], index: 3, kind: input, shape index: {}]   ;;  %s460_s4 = inlined_call_operand.hbm [shape: bf16[128,128], index: 4, kind: input, shape index: {}]   ;;  %s461_s5 = inlined_call_operand.hbm [shape: f32[8,128], index: 5, kind: output, shape index: {}]  }
   0x1   :  { %11 = vsyncpa [#allocation6], 0  ;;  %s28_s20 = sshll.u32 %s457_s1, 4  ;;  %s29_s20 = int_to_ptr.hbm [resolvable:$true] %s28_s20 }
   0x2   :  { %12 = vsyncpa [#allocation4], 0  ;;  %s402_s21 = smov [#allocation5]   ;;  %s18_s25 = sshll.u32 %s456_s0, 4  ;;  %s19_s25 = int_to_ptr.hbm [resolvable:$true] %s18_s25 }
   0x3   :  { %s30_s22 = sshll.u32 %s402_s21, 4  ;;  %s403_s26 = smov 64   ;;  %s31_s22 = int_to_ptr.vmem [resolvable:$true] %s30_s22 }
   0x4   :  { %s404_s27 = smov 4   ;;  %s405_s28 = smov [#allocation2]  }
   0x5   :  { %36 = dma.hbm_to_vmem [thread:$0]  %s29_s20, 256, %s31_s22, [#allocation6], %s403_s26, %s403_s26, %s404_s27  }
   0x6   :  { %s20_s29 = sshll.u32 %s405_s28, 4  ;;  %s45_s7 = sshll.u32 %s460_s4, 4  ;;  %s21_s29 = int_to_ptr.vmem [resolvable:$true] %s20_s29  ;;  %s46_s7 = int_to_ptr.hbm [resolvable:$true] %s45_s7 }
   0x7   :  { %23 = dma.hbm_to_vmem [thread:$0]  %s19_s25, 128, %s21_s29, [#allocation3]  }
   0x8   :  { %s406_s1 = smov [#allocation7]  }
   0x9   :  { %s47_s8 = sshll.u32 %s406_s1, 4  ;;  %s48_s8 = int_to_ptr.vmem [resolvable:$true] %s47_s8 }
   0xa   :  { %53 = dma.hbm_to_vmem [thread:$0]  %s46_s7, 1024, %s48_s8, [#allocation6], %s403_s26, %s403_s26, %s404_s27  }
   0xb   :  { %396 = dma.done.wait [#allocation3], 128  }
   0xc   :  { %397 = vsyncadd [#allocation3], 4294967168 }
   0xd   :  { %398 = dma.done.wait [#allocation6], 1280  }
   0xe   :  { %399 = vsyncadd [#allocation6], 4294966016  ;;  %v283_v0 = vld [vmem:[#allocation5 + $0x8] sm:$0xff]  ;;  %v282_v1 = vld [vmem:[#allocation5] sm:$0xff]  ;;  %vm85_vm0 = vcmask 261120   ;;  %s407_s11 = smov [#allocation8]  }
   0xf   :  { %95 = vmatpush.bf16.msra.mxu0 %v283_v0  ;;  %v67_v2 = vld [vmem:[#allocation2] sm:$0xff]  ;;  %v291_v4 = vld [vmem:[#allocation7 + $0x38] sm:$0xff]  ;;  %v290_v5 = vld [vmem:[#allocation7 + $0x30] sm:$0xff]  ;;  %s230_s14 = sshll.u32 %s461_s5, 4  ;;  %s231_s14 = int_to_ptr.hbm [resolvable:$true] %s230_s14 }
  0x10   :  { %v68_v3 = vpack.c.bf16 %v67_v2, %v67_v2  ;;  %209 = vmatpush.bf16.msra.mxu1 %v291_v4  ;;  %v289_v6 = vld [vmem:[#allocation7 + $0x28] sm:$0xff]  ;;  %v288_v7 = vld [vmem:[#allocation7 + $0x20] sm:$0xff]  ;;  %v287_v8 = vld [vmem:[#allocation7 + $0x18] sm:$0xff] }
  0x11   :  { %v286_v12 = vld [vmem:[#allocation7 + $0x10] sm:$0xff]  ;;  %v285_v17 = vld [vmem:[#allocation7 + $0x8] sm:$0xff]  ;;  %v284_v23 = vld [vmem:[#allocation7] sm:$0xff] }
  0x12   :  { %v119_v37 = vld [vmem:[%s458_s2] sm:$0x1]  ;;  %s228_s2 = sshll.u32 %s407_s11, 4  ;;  %s229_s2 = int_to_ptr.vmem [resolvable:$true] %s228_s2 }
  0x13   :  { %96 = vmatpush.bf16.msra.mxu0 %v282_v1  ;;  %v132_v41 = vld [vmem:[%s459_s3] sm:$0x1] }
  0x14   :  { %210 = vmatpush.bf16.msra.mxu1 %v290_v5 }
  0x16   :  { %249 = vmatmul.msk.bf16.vlgmr.msra.gmra.mxu0 %vm85_vm0, %v68_v3 }
  0x18   :  { %211 = vmatpush.bf16.msra.mxu1 %v289_v6 }
  0x1c   :  { %212 = vmatpush.bf16.msra.mxu1 %v288_v7 }
  0x20   :  { %213 = vmatpush.bf16.msra.mxu1 %v287_v8 }
  0x24   :  { %214 = vmatpush.bf16.msra.mxu1 %v286_v12 }
  0x28   :  { %215 = vmatpush.bf16.msra.mxu1 %v285_v17 }
  0x2c   :  { %216 = vmatpush.bf16.msra.mxu1 %v284_v23 }
  0x93   :  { %v98_v9 = vpop.f32.mrf.mxu0 }
  0x94   :  { %v102_v10 = vrot.slane %v98_v9, 4  ;;  %v109_v11 = vmul.f32 %v98_v9, %v98_v9 }
  0x96   :  { %v103_v13 = vadd.f32 %v102_v10, %v98_v9  ;;  %v110_v14 = vrot.slane %v109_v11, 4 }
  0x98   :  { %v104_v15 = vrot.slane %v103_v13, 2  ;;  %v111_v16 = vadd.f32 %v110_v14, %v109_v11 }
  0x9a   :  { %v105_v18 = vadd.f32 %v104_v15, %v103_v13  ;;  %v112_v19 = vrot.slane %v111_v16, 2 }
  0x9b   :  { %v100_v20 = vpop.f32.mrf.mxu0 }
  0x9c   :  { %v106_v21 = vrot.slane %v105_v18, 1  ;;  %v113_v22 = vadd.f32 %v112_v19, %v111_v16 }
  0x9e   :  { %v114_v24 = vrot.slane %v113_v22, 1  ;;  %v107_v25 = vadd.f32 %v106_v21, %v105_v18 }
  0xa0   :  { %v115_v26 = vadd.f32 %v114_v24, %v113_v22  ;;  %v108_v27 = vmul.f32 0.125, %v107_v25 }
  0xa2   :  { %v116_v28 = vmul.f32 0.125, %v115_v26  ;;  %v117_v29 = vmul.f32 %v108_v27, %v108_v27 }
  0xa4   :  { %v118_v30 = vsub.f32 %v116_v28, %v117_v29 }
  0xa6   :  { %v120_v31 = vadd.f32 1e-05, %v118_v30 }
  0xa8   :  { %298 = vrsqrt.f32 %v120_v31  ;;  %vm127_vm2 = vweird.f32 %v120_v31 }
  0xae   :  { %v299_v32 = vpop.eup %298 }
  0xaf   :  { %v122_v33 = vmul.f32 %v299_v32, %v120_v31  ;;  %vm128_vm1 = vweird.f32 %v299_v32 }
  0xb0   :  { %vm129_vm3 = vmor %vm127_vm2, %vm128_vm1 }
  0xb1   :  { %v123_v34 = vmul.f32 %v299_v32, %v122_v33 }
  0xb3   :  { %v124_v35 = vmul.f32 0.5, %v123_v34 }
  0xb5   :  { %v125_v36 = vsub.f32 1.5, %v124_v35 }
  0xb7   :  { %v126_v38 = vmul.f32 %v299_v32, %v125_v36 }
  0xb9   :  { %v130_v39 = vsel %vm129_vm3, %v299_v32, %v126_v38 }
  0xba   :  { %v131_v40 = vmul.f32 %v130_v39, %v119_v37 }
  0xbc   :  { %v133_v42 = vmul.f32 %v131_v40, %v108_v27  ;;  %v136_v43 = vperm.slane %v131_v40, 0 }
  0xbe   :  { %v134_v44 = vsub.f32 %v132_v41, %v133_v42  ;;  %v138_v45 = vmul.f32 %v136_v43, %v98_v9 }
  0xc0   :  { %v140_v46 = vperm.slane %v134_v44, 0 }
  0xc2   :  { %v142_v47 = vadd.f32 %v140_v46, %v138_v45 }
  0xc4   :  { %v143_v48 = vmax.f32 %v142_v47, 0.0 }
  0xc6   :  { %v144_v49 = vpack.c.bf16 %v143_v48, %v143_v48 }
  0xc8   :  { %217 = vmatmul.bf16.vlgmr.msra.gmra.mxu1 %v144_v49 }
 0x145   :  { %v218_v50 = vpop.f32.mrf.mxu1 }
 0x146   :  { %222 = vst [vmem:[#allocation8] sm:$0xff] %v218_v50 }
 0x147   :  { %233 = dma.vmem_to_hbm [thread:$0]  %s229_s2, 128, %s231_s14, [#allocation4]  }
 0x14d   :  { %v220_v51 = vpop.f32.mrf.mxu1 }
 0x14e   :  { %400 = dma.done.wait [#allocation4], 128  }
 0x14f   :  { %401 = vsyncadd [#allocation4], 4294967168 }
 0x150   :  { %238 = vsyncpa [#allocation3], 1 }
 0x151   :  { %239 = vsyncpa [#allocation6], 1 }
 0x152   :  { %240 = vsyncpa [#allocation4], 1 }

</bundles_post_ra>
